<compile_context>
chip_gen: v5e
topology: v5e:2x2
jax: 0.10.0
libtpu: 0.0.40
codegen_flags: <defaults>
</compile_context>

<pallas_src>
import math

import jax
import jax.numpy as jnp
from jax.experimental import pallas as pl
from jax.experimental.pallas import tpu as pltpu


# 20 / (100 * ln(10)) : fuses Log10, Multiply(20), Divide(100) into one scale.
_LOG_SCALE = 0.2 / math.log(10.0)


def _wave2spec_kernel(x_ref, o_ref):
    # x_ref / o_ref: one (1, 1, th*tw) lane-dense block per batch item.
    y = x_ref[...].astype(jnp.float32)
    # LowerThresh(1e-5)
    y = jnp.maximum(y, jnp.float32(1e-5))
    # Log10() * 20 - 20 + 100, all / 100  ==  log(y) * (0.2/ln10) + 0.8
    y = jnp.log(y) * jnp.float32(_LOG_SCALE) + jnp.float32(0.8)
    # Clip(0, 1)
    y = jnp.clip(y, 0.0, 1.0)
    o_ref[...] = y.astype(o_ref.dtype)


def wave2spectrogram(x, mel_num, spec_crop_len):
    """x: (mel, time) or (B, mel, time) float32 spectrogram.

    Returns (mel_num, spec_crop_len) or (B, mel_num, spec_crop_len).
    """
    squeeze = x.ndim == 2
    if squeeze:
        x = x[None]
    B, H, W = x.shape
    th, tw = mel_num, spec_crop_len

    # TrimSpec(173) folded into the crop offsets: the crop window always lies
    # within the first 173 time frames, so no x[:, :173] slice is needed.
    w_eff = min(W, 173)
    # torchvision CenterCrop offsets (same int(round(...)) as torchvision).
    top = int(round((H - th) / 2.0))
    left = int(round((w_eff - tw) / 2.0))
    # TODO(synk): torchvision CenterCrop zero-pads when target > input; that
    # branch is not implemented (asserted away).
    assert 0 <= top and 0 <= left and top + th <= H and left + tw <= w_eff

    # Crop-as-DMA: slice exactly the (th, tw) window once, then present it to
    # the kernel as a lane-dense (B, 1, th*tw) slab (free contiguous reshape).
    xc = x[:, top:top + th, left:left + tw].reshape(B, 1, th * tw)

    out = pl.pallas_call(
        _wave2spec_kernel,
        out_shape=jax.ShapeDtypeStruct((B, 1, th * tw), x.dtype),
        grid=(B,),
        in_specs=[pl.BlockSpec((1, 1, th * tw), lambda b: (b, 0, 0))],
        out_specs=pl.BlockSpec((1, 1, th * tw), lambda b: (b, 0, 0)),
        compiler_params=pltpu.CompilerParams(
            # Batch items are independent: shard across both TensorCores on
            # v7x; harmless on v5e/v6e (single TC).
            dimension_semantics=("parallel",),
        ),
    )(xc)

    out = out.reshape(B, th, tw)
    return out[0] if squeeze else out


def _reference(x, mel_num, spec_crop_len):
    # Pure-JAX reference mirroring the PyTorch transform chain (unbatched).
    y = jnp.maximum(x, 1e-5)
    y = jnp.log10(y)
    y = y * 20.0
    y = y - 20.0
    y = y + 100.0
    y = y / 100.0
    y = jnp.clip(y, 0.0, 1.0)
    y = y[:, :173]
    H, W = y.shape
    top = int(round((H - mel_num) / 2.0))
    left = int(round((W - spec_crop_len) / 2.0))
    return y[top:top + mel_num, left:left + spec_crop_len]


if __name__ == "__main__":
    key = jax.random.PRNGKey(0)
    # Canonical Wave2Spectrogram config (80 mel, 160-frame crop); time > 173 so
    # the folded TrimSpec actually matters. Magnitude-like (non-negative) data.
    B, MEL, T = 2, 80, 190
    mel_num, spec_crop_len = 80, 160

    x = jax.random.uniform(key, (B, MEL, T), dtype=jnp.float32,
                           minval=0.0, maxval=2.0)

    fn = jax.jit(wave2spectrogram, static_argnums=(1, 2))

    # Batched path.
    out = jax.block_until_ready(fn(x, mel_num, spec_crop_len))
    assert out.shape == (B, mel_num, spec_crop_len)
    ref = jnp.stack([_reference(x[b], mel_num, spec_crop_len) for b in range(B)])
    assert jnp.allclose(out, ref, atol=1e-5, rtol=1e-5)

    # Unbatched (module-native 2D) path.
    out2 = jax.block_until_ready(fn(x[0], mel_num, spec_crop_len))
    assert out2.shape == (mel_num, spec_crop_len)
    assert jnp.allclose(out2, _reference(x[0], mel_num, spec_crop_len),
                        atol=1e-5, rtol=1e-5)

    print("KERNEL_OK")
</pallas_src>

<mosaic_0001>
module attributes {stable_mosaic.version = 11 : i64} {
  func.func @_wave2spec_kernel(%arg0: i32, %arg1: memref<1x1x12800xf32, #tpu.memory_space<vmem>>, %arg2: memref<1x1x12800xf32, #tpu.memory_space<vmem>>) attributes {dimension_semantics = [#tpu.dimension_semantics<parallel>], iteration_bounds = array<i64: 2>, scalar_prefetch = 0 : i64, scratch_operands = 0 : i64, tpu.core_type = #tpu.core_type<tc>, window_params = [{transform_indices = @transform_0, window_bounds = array<i64: 1, 1, 12800>}, {transform_indices = @transform_1, window_bounds = array<i64: 1, 1, 12800>}]} {
    %c0 = arith.constant 0 : index
    %c0_0 = arith.constant 0 : index
    %c0_1 = arith.constant 0 : index
    %0 = vector.load %arg1[%c0, %c0_0, %c0_1] : memref<1x1x12800xf32, #tpu.memory_space<vmem>>, vector<1x1x12800xf32>
    %cst = arith.constant 9.99999974E-6 : f32
    %1 = vector.broadcast %cst : f32 to vector<1x1x12800xf32>
    %2 = arith.maximumf %0, %1 : vector<1x1x12800xf32>
    %3 = math.log %2 : vector<1x1x12800xf32>
    %cst_2 = arith.constant 0.0868588984 : f32
    %4 = vector.broadcast %cst_2 : f32 to vector<1x1x12800xf32>
    %5 = arith.mulf %3, %4 : vector<1x1x12800xf32>
    %cst_3 = arith.constant 8.000000e-01 : f32
    %6 = vector.broadcast %cst_3 : f32 to vector<1x1x12800xf32>
    %7 = arith.addf %5, %6 : vector<1x1x12800xf32>
    %cst_4 = arith.constant 0.000000e+00 : f32
    %cst_5 = arith.constant 1.000000e+00 : f32
    %8 = vector.broadcast %cst_4 : f32 to vector<1x1x12800xf32>
    %9 = arith.maximumf %8, %7 : vector<1x1x12800xf32>
    %10 = vector.broadcast %cst_5 : f32 to vector<1x1x12800xf32>
    %11 = arith.minimumf %10, %9 : vector<1x1x12800xf32>
    %c0_6 = arith.constant 0 : index
    %c0_7 = arith.constant 0 : index
    %c0_8 = arith.constant 0 : index
    %12 = vector.load %arg2[%c0_6, %c0_7, %c0_8] : memref<1x1x12800xf32, #tpu.memory_space<vmem>>, vector<1x1x12800xf32>
    tpu.vector_store %arg2[%c0_6, %c0_7, %c0_8], %11 {strides = array<i32>} : memref<1x1x12800xf32, #tpu.memory_space<vmem>>, vector<1x1x12800xf32>,
    return
  }
  func.func @transform_0(%arg0: i32) -> (i32, i32, i32) {
    %c0_i32 = arith.constant 0 : i32
    %c0_i32_0 = arith.constant 0 : i32
    %c0_i32_1 = arith.constant 0 : i32
    return %arg0, %c0_i32, %c0_i32_0 : i32, i32, i32
  }
  func.func @transform_1(%arg0: i32) -> (i32, i32, i32) {
    %c0_i32 = arith.constant 0 : i32
    %c0_i32_0 = arith.constant 0 : i32
    %c0_i32_1 = arith.constant 0 : i32
    return %arg0, %c0_i32, %c0_i32_0 : i32, i32, i32
  }
}

</mosaic_0001>

<bundles_post_ra>
// kernel: wave2spectrogram.1
= control target key start
LH: loop header
LB: loop body
LE: loop exit
PB: predicated region body
PF: predicated region fallthrough
CT: control target
= control target key end

     0   :  { %s346_s6 = smov 0   ;;  %s400_s0 = inlined_call_operand.vmem [shape: f32[2,1,12800], index: 0, kind: input, shape index: {}]   ;;  %s401_s1 = inlined_call_operand.vmem [shape: f32[2,1,12800], index: 1, kind: output, shape index: {}]  }
   0x1 LB: > { %s286_s7 = sadd.s32 4294967295, %s334_s6   ;;  %p290_p0 = scmp.ge.s32.totalorder %s334_s6, 1  ;;  %s334_s6 = sphi %s346_s6, %s11_s6  }
   0x2   : > { %p86_p1 = scmp.lt.s32.totalorder %s334_s6, 3 }
   0x4   : > { %p87_p2 = pnand %p290_p0, %p86_p1 }
   0x5   : > { %p104_p3 = scmp.lt.s32.totalorder (!%p87_p2), %s286_s7, 1 }
   0x6   : > { %90 = sbr.rel (%p87_p2) target bundleno = 52 (0x34), region = 24 }
   0xb   : > { %s403_s7 = smov (!%p104_p3, %s286_s7), 1 }
   0xc   : > { %s293_s8 = smul.u32 100, %s403_s7 }
   0xe   : > { %s362_s11 = scalar_lea.vmem %s400_s0, %s293_s8  ;;  %s382_s14 = scalar_lea.vmem %s401_s1, %s293_s8 }
   0xf   : > { %v112_v0 = vld [vmem:[%s362_s11] sm:$0xff]  ;;  %v113_v1 = vld [vmem:[%s362_s11 + $0x8] sm:$0xff]  ;;  %v114_v2 = vld [vmem:[%s362_s11 + $0x10] sm:$0xff] }
  0x10   : > { %v125_v3 = vmax.f32 %v112_v0, 1e-05  ;;  %v126_v4 = vmax.f32 %v113_v1, 1e-05  ;;  %v127_v5 = vmax.f32 %v114_v2, 1e-05 }
  0x11   : > { %v115_v6 = vld [vmem:[%s362_s11 + $0x18] sm:$0xff]  ;;  %v116_v7 = vld [vmem:[%s362_s11 + $0x20] sm:$0xff]  ;;  %v117_v8 = vld [vmem:[%s362_s11 + $0x28] sm:$0xff] }
  0x12   : > { %302 = vlog2.f32 %v125_v3  ;;  %v128_v9 = vmax.f32 %v115_v6, 1e-05  ;;  %v129_v10 = vmax.f32 %v116_v7, 1e-05  ;;  %v130_v11 = vmax.f32 %v117_v8, 1e-05 }
  0x13   : > { %304 = vlog2.f32 %v126_v4  ;;  %v118_v12 = vld [vmem:[%s362_s11 + $0x30] sm:$0xff]  ;;  %v119_v13 = vld [vmem:[%s362_s11 + $0x38] sm:$0xff]  ;;  %v120_v14 = vld [vmem:[%s362_s11 + $0x40] sm:$0xff] }
  0x14   : > { %306 = vlog2.f32 %v127_v5  ;;  %v131_v15 = vmax.f32 %v118_v12, 1e-05  ;;  %v132_v16 = vmax.f32 %v119_v13, 1e-05  ;;  %v133_v17 = vmax.f32 %v120_v14, 1e-05 }
  0x15   : > { %308 = vlog2.f32 %v128_v9  ;;  %v121_v18 = vld [vmem:[%s362_s11 + $0x48] sm:$0xff]  ;;  %v122_v19 = vld [vmem:[%s362_s11 + $0x50] sm:$0xff]  ;;  %v123_v21 = vld [vmem:[%s362_s11 + $0x58] sm:$0xff] }
  0x16   : > { %310 = vlog2.f32 %v129_v10  ;;  %v134_v24 = vmax.f32 %v121_v18, 1e-05  ;;  %v124_v25 = vld [vmem:[%s362_s11 + $0x60] sm:$0xf]  ;;  %v135_v28 = vmax.f32 %v122_v19, 1e-05 }
  0x17   : > { %312 = vlog2.f32 %v130_v11  ;;  %v136_v32 = vmax.f32 %v123_v21, 1e-05  ;;  %v137_v36 = vmax.f32 %v124_v25, 1e-05 }
  0x18   : > { %v303_v20 = vpop.eup %302  ;;  %314 = vlog2.f32 %v131_v15 }
  0x19   : > { %v305_v22 = vpop.eup %304  ;;  %v139_v23 = vmul.f32 0.6931472, %v303_v20  ;;  %316 = vlog2.f32 %v132_v16 }
  0x1a   : > { %v307_v26 = vpop.eup %306  ;;  %v141_v27 = vmul.f32 0.6931472, %v305_v22  ;;  %318 = vlog2.f32 %v133_v17 }
  0x1b   : > { %v309_v29 = vpop.eup %308  ;;  %v164_v30 = vmul.f32 0.0868589, %v139_v23  ;;  %v143_v31 = vmul.f32 0.6931472, %v307_v26  ;;  %320 = vlog2.f32 %v134_v24 }
  0x1c   : > { %v311_v33 = vpop.eup %310  ;;  %v165_v34 = vmul.f32 0.0868589, %v141_v27  ;;  %v145_v35 = vmul.f32 0.6931472, %v309_v29  ;;  %322 = vlog2.f32 %v135_v28 }
  0x1d   : > { %v313_v37 = vpop.eup %312  ;;  %v177_v38 = vadd.f32 0.8, %v164_v30  ;;  %v166_v39 = vmul.f32 0.0868589, %v143_v31  ;;  %v147_v40 = vmul.f32 0.6931472, %v311_v33  ;;  %324 = vlog2.f32 %v136_v32 }
  0x1e   : > { %v315_v41 = vpop.eup %314  ;;  %v178_v42 = vadd.f32 0.8, %v165_v34  ;;  %v167_v43 = vmul.f32 0.0868589, %v145_v35  ;;  %v149_v44 = vmul.f32 0.6931472, %v313_v37  ;;  %326 = vlog2.f32 %v137_v36 }
  0x1f   : > { %v317_v45 = vpop.eup %316  ;;  %v190_v46 = vmax.f32 %v177_v38, 0.0  ;;  %v179_v47 = vadd.f32 0.8, %v166_v39  ;;  %v168_v48 = vmul.f32 0.0868589, %v147_v40  ;;  %v228_v32 = vlaneseq }
  0x20   : > { %v319_v49 = vpop.eup %318  ;;  %v191_v50 = vmax.f32 %v178_v42, 0.0  ;;  %v180_v51 = vadd.f32 0.8, %v167_v43  ;;  %v169_v52 = vmul.f32 0.0868589, %v149_v44 }
  0x21   : > { %v203_v53 = vmin.f32 %v190_v46, 1.0  ;;  %v192_v54 = vmax.f32 %v179_v47, 0.0  ;;  %v181_v55 = vadd.f32 0.8, %v168_v48  ;;  %v151_v56 = vmul.f32 0.6931472, %v315_v41  ;;  %v321_v61 = vpop.eup %320 }
  0x22   : > { %v204_v57 = vmin.f32 %v191_v50, 1.0  ;;  %v193_v58 = vmax.f32 %v180_v51, 0.0  ;;  %v182_v59 = vadd.f32 0.8, %v169_v52  ;;  %v153_v60 = vmul.f32 0.6931472, %v317_v45  ;;  %v323_v2 = vpop.eup %322 }
  0x23   : > { %216 = vst [vmem:[%s382_s14] sm:$0xff] %v203_v53  ;;  %v205_v62 = vmin.f32 %v192_v54, 1.0  ;;  %v194_v63 = vmax.f32 %v181_v55, 0.0  ;;  %v170_v0 = vmul.f32 0.0868589, %v151_v56  ;;  %v155_v1 = vmul.f32 0.6931472, %v319_v49  ;;  %v325_v6 = vpop.eup %324 }
  0x24   : > { %217 = vst [vmem:[%s382_s14 + $0x8] sm:$0xff] %v204_v57  ;;  %v206_v3 = vmin.f32 %v193_v58, 1.0  ;;  %v195_v4 = vmax.f32 %v182_v59, 0.0  ;;  %v171_v5 = vmul.f32 0.0868589, %v153_v60  ;;  %v327_v10 = vpop.eup %326  ;;  %vm230_vm0 = vcmp.lt.s32.totalorder %v228_v32, 512 }
  0x25   : > { %218 = vst [vmem:[%s382_s14 + $0x10] sm:$0xff] %v205_v62  ;;  %v207_v7 = vmin.f32 %v194_v63, 1.0  ;;  %v183_v8 = vadd.f32 0.8, %v170_v0  ;;  %v172_v9 = vmul.f32 0.0868589, %v155_v1 }
  0x26   : > { %219 = vst [vmem:[%s382_s14 + $0x18] sm:$0xff] %v206_v3  ;;  %v208_v11 = vmin.f32 %v195_v4, 1.0  ;;  %v184_v12 = vadd.f32 0.8, %v171_v5  ;;  %v157_v13 = vmul.f32 0.6931472, %v321_v61 }
  0x27   : > { %220 = vst [vmem:[%s382_s14 + $0x20] sm:$0xff] %v207_v7  ;;  %v196_v14 = vmax.f32 %v183_v8, 0.0  ;;  %v185_v15 = vadd.f32 0.8, %v172_v9  ;;  %v159_v16 = vmul.f32 0.6931472, %v323_v2 }
  0x28   : > { %221 = vst [vmem:[%s382_s14 + $0x28] sm:$0xff] %v208_v11  ;;  %v197_v17 = vmax.f32 %v184_v12, 0.0  ;;  %v173_v18 = vmul.f32 0.0868589, %v157_v13  ;;  %v161_v19 = vmul.f32 0.6931472, %v325_v6 }
  0x29   : > { %v209_v20 = vmin.f32 %v196_v14, 1.0  ;;  %v198_v21 = vmax.f32 %v185_v15, 0.0  ;;  %v174_v22 = vmul.f32 0.0868589, %v159_v16  ;;  %v163_v23 = vmul.f32 0.6931472, %v327_v10 }
  0x2a   : > { %v210_v24 = vmin.f32 %v197_v17, 1.0  ;;  %v186_v25 = vadd.f32 0.8, %v173_v18  ;;  %v175_v26 = vmul.f32 0.0868589, %v161_v19 }
  0x2b   : > { %222 = vst [vmem:[%s382_s14 + $0x30] sm:$0xff] %v209_v20  ;;  %v211_v27 = vmin.f32 %v198_v21, 1.0  ;;  %v187_v28 = vadd.f32 0.8, %v174_v22  ;;  %v176_v29 = vmul.f32 0.0868589, %v163_v23 }
  0x2c   : > { %223 = vst [vmem:[%s382_s14 + $0x38] sm:$0xff] %v210_v24  ;;  %v199_v30 = vmax.f32 %v186_v25, 0.0  ;;  %v188_v31 = vadd.f32 0.8, %v175_v26 }
  0x2d   : > { %224 = vst [vmem:[%s382_s14 + $0x40] sm:$0xff] %v211_v27  ;;  %v200_v33 = vmax.f32 %v187_v28, 0.0  ;;  %v189_v34 = vadd.f32 0.8, %v176_v29 }
  0x2e   : > { %v212_v35 = vmin.f32 %v199_v30, 1.0  ;;  %v201_v36 = vmax.f32 %v188_v31, 0.0 }
  0x2f   : > { %v213_v37 = vmin.f32 %v200_v33, 1.0  ;;  %v202_v38 = vmax.f32 %v189_v34, 0.0 }
  0x30   : > { %225 = vst [vmem:[%s382_s14 + $0x48] sm:$0xff] %v212_v35  ;;  %v214_v39 = vmin.f32 %v201_v36, 1.0 }
  0x31   : > { %226 = vst [vmem:[%s382_s14 + $0x50] sm:$0xff] %v213_v37  ;;  %v215_v40 = vmin.f32 %v202_v38, 1.0 }
  0x32   : > { %227 = vst [vmem:[%s382_s14 + $0x58] sm:$0xff] %v214_v39 }
  0x33   : > { %232 = vst.msk [vmem:[%s382_s14 + $0x60] sm:$0xf] %vm230_vm0, %v215_v40 }
  0x34 PF: > { %s11_s6 = sadd.s32 1, %s334_s6  }
  0x35   : > { %p8_p4 = scmp.ge.s32.totalorder %s11_s6, 4  }
  0x37   :  { %10 = sbr.rel (!%p8_p4) target bundleno = 1 (0x1), region = 54 }

</bundles_post_ra>
